<compile_context>
chip_gen: v5e
topology: v5e:2x2
jax: 0.10.0
libtpu: 0.0.40
codegen_flags: <defaults>
</compile_context>

<pallas_src>
import functools
import math

import jax
import jax.numpy as jnp
from jax.experimental import pallas as pl
from jax.experimental.pallas import tpu as pltpu


def _label_smoothing_kernel(x_ref, tgt_ref, sum_ref, tsum_ref, *,
                            padding_idx, slab_rows):
    """One grid step over a (tile_rows, V) tile of log-probs.

    Accumulates into two resident (1, 8, V) f32 output blocks:
      sum_ref  += row-sums of x over rows with target != padding_idx
      tsum_ref += row-sums of x masked to the target column (valid rows only)
    The label-smoothing constants are applied wrapper-side (closed form).
    """
    j = pl.program_id(1)

    @pl.when(j == 0)
    def _():
        sum_ref[...] = jnp.zeros_like(sum_ref)
        tsum_ref[...] = jnp.zeros_like(tsum_ref)

    tile_rows, v = x_ref.shape
    n_slabs = tile_rows // slab_rows
    # Lane-index constant, hoisted out of the slab loop.
    col = jax.lax.broadcasted_iota(jnp.int32, (slab_rows, v), 1)

    def body(s, carry):
        r0 = pl.multiple_of(s * slab_rows, slab_rows)
        x = x_ref[pl.ds(r0, slab_rows), :]      # native dtype (bf16 stays bf16)
        t = tgt_ref[pl.ds(r0, slab_rows), :]    # (slab_rows, 1) int32
        # Row-valid mask in the input dtype (2x packed VPU for bf16 on
        # v6e/v7x); select semantics also neutralize garbage read from the
        # partial edge block (those rows carry target == padding_idx).
        xm = jnp.where(t != padding_idx, x, jnp.zeros((), x.dtype))
        xm32 = xm.astype(jnp.float32)
        xt32 = jnp.where(col == t, xm32, 0.0)   # target column only
        # Reduce rows in groups of 8 (VPU-only adds, lane axis preserved) and
        # accumulate into the resident output blocks.
        sum_ref[...] += xm32.reshape(slab_rows // 8, 8, v).sum(axis=0)[None]
        tsum_ref[...] += xt32.reshape(slab_rows // 8, 8, v).sum(axis=0)[None]
        return carry

    jax.lax.fori_loop(0, n_slabs, body, 0, unroll=n_slabs <= 8)


def label_smoothing_loss(x, target, *, size, padding_idx, smoothing,
                         num_shards=1, max_block_bytes=None,
                         vmem_limit_bytes=None):
    """x: (B, S, V) log-probs (any float dtype), target: (B, S) ints.
    Returns the scalar KLDivLoss(reduction='sum') against the smoothed dist.

    Closed form per valid row (target != padding_idx):
        loss_row = C_row - smooth*sum_v x - (conf - smooth)*x[target]
                   + smooth*x[padding_idx]
        C_row    = conf*log(conf) + (V-2)*smooth*log(smooth)
    so the kernel only accumulates two masked sums of x.
    """
    B, S, V = x.shape
    assert V == size
    N = B * S

    confidence = 1.0 - float(smoothing)
    smooth_val = float(smoothing) / (size - 2)
    log_conf = math.log(confidence) if confidence > 0.0 else 0.0
    log_smooth = math.log(smooth_val) if smooth_val > 0.0 else 0.0
    c_row = confidence * log_conf + (size - 2) * smooth_val * log_smooth

    # Generation-aware tile / VMEM budget (v5e/v6e: 128 MiB VMEM; v7x: 64 MiB).
    if max_block_bytes is None or vmem_limit_bytes is None:
        vmem_cap = 64 * 1024 * 1024
        try:
            vmem_cap = int(getattr(pltpu.get_tpu_info(),
                                   "vmem_capacity_bytes", vmem_cap))
        except Exception:
            pass
        if vmem_cap >= 96 * 1024 * 1024:        # v5e / v6e
            default_block, default_limit = 8 * 1024 * 1024, 64 * 1024 * 1024
        else:                                   # v7x (or unknown): stay tight
            default_block, default_limit = 6 * 1024 * 1024, 40 * 1024 * 1024
        if max_block_bytes is None:
            max_block_bytes = default_block
        if vmem_limit_bytes is None:
            vmem_limit_bytes = default_limit

    # Keep the native dtype (bf16 stays bf16 -> half the HBM traffic); the cast
    # to f32 happens inside the kernel, after the masking selects.
    x2 = x.reshape(N, V)
    t2 = target.reshape(N, 1).astype(jnp.int32)

    itemsize = jnp.dtype(x2.dtype).itemsize
    row_align = {1: 32, 2: 16, 4: 8}.get(itemsize, 8)     # sublane packing
    lane_cols = max(-(-V // 128) * 128, 128)
    lane_bytes = lane_cols * itemsize
    tile_rows = max(row_align,
                    (max_block_bytes // lane_bytes) // row_align * row_align)
    rows_per_shard = -(-N // num_shards)
    tile_rows = min(tile_rows, -(-rows_per_shard // row_align) * row_align)

    tiles_per_shard = -(-rows_per_shard // tile_rows)
    total_blocks = num_shards * tiles_per_shard
    total_rows = total_blocks * tile_rows
    n_blocks_valid = -(-N // tile_rows)         # blocks touching rows < N

    # Slab size for the in-kernel reduction loop: bounds live f32 intermediates
    # to ~2 MiB regardless of tile_rows (lets tiles be large without risking a
    # VMEM blowup if Mosaic does not fully fuse the select chain).
    slab_rows = row_align
    for cand in (256, 128, 64, 32, 16, 8):
        if (cand % row_align == 0 and tile_rows % cand == 0
                and cand * lane_cols * 4 <= 2 * 1024 * 1024):
            slab_rows = cand
            break

    # Only the tiny target array gets padded (constant_values=padding_idx), so
    # overhanging rows are masked out in-kernel.  x itself is NOT padded: that
    # would be a full extra HBM read+write pass over the activations.
    if total_rows > N:
        t2 = jnp.pad(t2, ((0, total_rows - N), (0, 0)),
                     constant_values=padding_idx)

    if total_blocks <= n_blocks_valid:
        # No block lies entirely past row N (always true for num_shards == 1).
        x_index = lambda c, j: (c * tiles_per_shard + j, 0)
    else:
        # Shard rounding pushed trailing blocks past the end of x: clamp so
        # they re-read the last in-bounds block instead of a fully-OOB DMA.
        # Their target rows are all padding_idx, so they contribute zero
        # regardless of what x data is read.
        last_block = n_blocks_valid - 1
        x_index = lambda c, j: (jnp.minimum(c * tiles_per_shard + j,
                                            last_block), 0)
    t_index = lambda c, j: (c * tiles_per_shard + j, 0)

    kernel = functools.partial(_label_smoothing_kernel,
                               padding_idx=padding_idx, slab_rows=slab_rows)

    sum_p, tgt_p = pl.pallas_call(
        kernel,
        out_shape=(jax.ShapeDtypeStruct((num_shards, 8, V), jnp.float32),
                   jax.ShapeDtypeStruct((num_shards, 8, V), jnp.float32)),
        grid_spec=pltpu.PrefetchScalarGridSpec(
            num_scalar_prefetch=0,
            grid=(num_shards, tiles_per_shard),
            in_specs=[
                pl.BlockSpec((tile_rows, V), x_index),
                pl.BlockSpec((tile_rows, 1), t_index),
            ],
            out_specs=[
                pl.BlockSpec((1, 8, V), lambda c, j: (c, 0, 0)),
                pl.BlockSpec((1, 8, V), lambda c, j: (c, 0, 0)),
            ],
        ),
        compiler_params=pltpu.CompilerParams(
            # Leading axis "parallel" so a multi-shard grid can split across
            # TensorCores; reduction axis "arbitrary" (resident accumulators).
            # TODO(synk): on v7x verify both TCs engage; if not, switch the
            # shard axis to pltpu.CORE_PARALLEL or an explicit pl.core_map.
            dimension_semantics=("parallel", "arbitrary"),
            vmem_limit_bytes=vmem_limit_bytes),
    )(x2, t2)

    n_valid = jnp.sum((target != padding_idx).astype(jnp.float32))
    s_total = jnp.sum(sum_p)                     # sum_{valid n, v} x[n, v]
    p_total = jnp.sum(sum_p[..., padding_idx])   # sum_{valid n} x[n, pad]
    t_total = jnp.sum(tgt_p)                     # sum_{valid n} x[n, target[n]]

    return (n_valid * c_row
            - smooth_val * s_total
            - (confidence - smooth_val) * t_total
            + smooth_val * p_total)


def _reference(x, target, *, size, padding_idx, smoothing):
    """Pure-JAX reference mirroring the PyTorch module."""
    confidence = 1.0 - smoothing
    x = x.astype(jnp.float32)
    V = x.shape[-1]
    col = jnp.arange(V)[None, None, :]
    td = jnp.full(x.shape, smoothing / (size - 2), jnp.float32)
    td = jnp.where(col == target[..., None], confidence, td)
    td = jnp.where(col == padding_idx, 0.0, td)
    td = jnp.where((target == padding_idx)[..., None], 0.0, td)
    safe = jnp.where(td > 0, td, 1.0)
    return jnp.sum(jnp.where(td > 0, td * (jnp.log(safe) - x), 0.0))


if __name__ == "__main__":
    # ---- Case 1: small f32 config, single tile -------------------------------
    size, padding_idx, smoothing = 32, 0, 0.1
    B, S = 2, 8
    k_x, k_t = jax.random.split(jax.random.PRNGKey(0))
    logits = jax.random.normal(k_x, (B, S, size), dtype=jnp.float32)
    x = jax.nn.log_softmax(logits, axis=-1)
    target = jax.random.randint(k_t, (B, S), 0, size, dtype=jnp.int32)
    target = target.at[0, 0].set(padding_idx).at[1, 3].set(padding_idx)

    loss = label_smoothing_loss(x, target, size=size,
                                padding_idx=padding_idx, smoothing=smoothing)
    loss = jax.block_until_ready(loss)
    ref = _reference(x, target, size=size,
                     padding_idx=padding_idx, smoothing=smoothing)
    assert jnp.allclose(loss, ref, rtol=1e-5, atol=1e-5), (loss, ref)

    # ---- Case 2: bf16, V not multiple of 128, multi-tile, unpadded edge block --
    size2, pad2, smooth2 = 160, 0, 0.2
    B2, S2 = 3, 37
    k_x2, k_t2 = jax.random.split(jax.random.PRNGKey(0))
    logits2 = jax.random.normal(k_x2, (B2, S2, size2), dtype=jnp.float32)
    x_bf16 = jax.nn.log_softmax(logits2, axis=-1).astype(jnp.bfloat16)
    target2 = jax.random.randint(k_t2, (B2, S2), 0, size2, dtype=jnp.int32)
    target2 = target2.at[0, 1].set(pad2).at[2, 10].set(pad2)

    loss2 = label_smoothing_loss(x_bf16, target2, size=size2, padding_idx=pad2,
                                 smoothing=smooth2, max_block_bytes=16 * 1024)
    loss2 = jax.block_until_ready(loss2)
    ref2 = _reference(x_bf16, target2, size=size2, padding_idx=pad2,
                      smoothing=smooth2)
    assert jnp.allclose(loss2, ref2, rtol=1e-4, atol=1e-3), (loss2, ref2)

    # ---- Case 3: degenerate smoothing=0.0 (pure NLL at the target column) -----
    loss3 = label_smoothing_loss(x, target, size=size,
                                 padding_idx=padding_idx, smoothing=0.0)
    loss3 = jax.block_until_ready(loss3)
    ref3 = _reference(x, target, size=size,
                      padding_idx=padding_idx, smoothing=0.0)
    assert jnp.allclose(loss3, ref3, rtol=1e-5, atol=1e-5), (loss3, ref3)

    # ---- Case 4: two-shard grid (v7x-style parallel axis), even block split ----
    size4, pad4, smooth4 = 64, 0, 0.1
    B4, S4 = 4, 32
    k_x4, k_t4 = jax.random.split(jax.random.PRNGKey(0))
    logits4 = jax.random.normal(k_x4, (B4, S4, size4), dtype=jnp.float32)
    x4 = jax.nn.log_softmax(logits4, axis=-1)
    target4 = jax.random.randint(k_t4, (B4, S4), 0, size4, dtype=jnp.int32)
    target4 = target4.at[0, 0].set(pad4).at[3, 7].set(pad4)

    loss4 = label_smoothing_loss(x4, target4, size=size4, padding_idx=pad4,
                                 smoothing=smooth4, num_shards=2,
                                 max_block_bytes=16 * 1024)
    loss4 = jax.block_until_ready(loss4)
    ref4 = _reference(x4, target4, size=size4, padding_idx=pad4,
                      smoothing=smooth4)
    assert jnp.allclose(loss4, ref4, rtol=1e-5, atol=1e-4), (loss4, ref4)

    print("KERNEL_OK")
</pallas_src>

<mosaic_0001>
module attributes {stable_mosaic.version = 11 : i64} {
  func.func @_label_smoothing_kernel(%arg0: i32, %arg1: i32, %arg2: memref<16x32xf32, #tpu.memory_space<vmem>>, %arg3: memref<16x1xi32, #tpu.memory_space<vmem>>, %arg4: memref<1x8x32xf32, #tpu.memory_space<vmem>>, %arg5: memref<1x8x32xf32, #tpu.memory_space<vmem>>) attributes {dimension_semantics = [#tpu.dimension_semantics<parallel>, #tpu.dimension_semantics<arbitrary>], iteration_bounds = array<i64: 1, 1>, scalar_prefetch = 0 : i64, scratch_operands = 0 : i64, tpu.core_type = #tpu.core_type<tc>, window_params = [{transform_indices = @transform_0, window_bounds = array<i64: 16, 32>}, {transform_indices = @transform_1, window_bounds = array<i64: 16, 1>}, {transform_indices = @transform_2, window_bounds = array<i64: 1, 8, 32>}, {transform_indices = @transform_3, window_bounds = array<i64: 1, 8, 32>}]} {
    %c0_i32 = arith.constant 0 : i32
    %0 = arith.cmpi eq, %arg1, %c0_i32 : i32
    %1 = arith.extui %0 : i1 to i32
    %c0_i32_0 = arith.constant 0 : i32
    %2 = arith.cmpi ne, %1, %c0_i32_0 : i32
    scf.if %2 {
      %cst_19 = arith.constant 0.000000e+00 : f32
      %32 = vector.broadcast %cst_19 : f32 to vector<1x8x32xf32>
      %c0_20 = arith.constant 0 : index
      %c0_21 = arith.constant 0 : index
      %c0_22 = arith.constant 0 : index
      %33 = vector.load %arg4[%c0_20, %c0_21, %c0_22] : memref<1x8x32xf32, #tpu.memory_space<vmem>>, vector<1x8x32xf32>
      tpu.vector_store %arg4[%c0_20, %c0_21, %c0_22], %32 {strides = array<i32>} : memref<1x8x32xf32, #tpu.memory_space<vmem>>, vector<1x8x32xf32>,
      %cst_23 = arith.constant 0.000000e+00 : f32
      %34 = vector.broadcast %cst_23 : f32 to vector<1x8x32xf32>
      %c0_24 = arith.constant 0 : index
      %c0_25 = arith.constant 0 : index
      %c0_26 = arith.constant 0 : index
      %35 = vector.load %arg5[%c0_24, %c0_25, %c0_26] : memref<1x8x32xf32, #tpu.memory_space<vmem>>, vector<1x8x32xf32>
      tpu.vector_store %arg5[%c0_24, %c0_25, %c0_26], %34 {strides = array<i32>} : memref<1x8x32xf32, #tpu.memory_space<vmem>>, vector<1x8x32xf32>,
    } else {
    }
    %3 = tpu.iota {dimensions = array<i32: 1>} : vector<16x32xi32>
    %c0_i32_1 = arith.constant 0 : i32
    %c16_i32 = arith.constant 16 : i32
    %4 = arith.muli %c0_i32_1, %c16_i32 : i32
    %5 = tpu.assume_multiple %4, 16 : i32
    %6 = arith.index_cast %5 : i32 to index
    %c0 = arith.constant 0 : index
    %7 = vector.load %arg2[%6, %c0] : memref<16x32xf32, #tpu.memory_space<vmem>>, vector<16x32xf32>
    %8 = arith.index_cast %5 : i32 to index
    %c0_2 = arith.constant 0 : index
    %9 = vector.load %arg3[%8, %c0_2] : memref<16x1xi32, #tpu.memory_space<vmem>>, vector<16x1xi32>
    %c0_i32_3 = arith.constant 0 : i32
    %10 = vector.broadcast %c0_i32_3 : i32 to vector<16x1xi32>
    %11 = arith.cmpi ne, %9, %10 : vector<16x1xi32>
    %cst = arith.constant 0.000000e+00 : f32
    %12 = vector.shape_cast %11 : vector<16x1xi1> to vector<16x1xi1>
    %13 = vector.broadcast %12 : vector<16x1xi1> to vector<16x32xi1>
    %14 = vector.broadcast %cst : f32 to vector<16x32xf32>
    %15 = arith.select %13, %7, %14 : vector<16x32xi1>, vector<16x32xf32>
    %16 = vector.broadcast %9 : vector<16x1xi32> to vector<16x32xi32>
    %17 = arith.cmpi eq, %3, %16 : vector<16x32xi32>
    %cst_4 = arith.constant 0.000000e+00 : f32
    %18 = vector.broadcast %cst_4 : f32 to vector<16x32xf32>
    %19 = arith.select %17, %15, %18 : vector<16x32xi1>, vector<16x32xf32>
    %c0_5 = arith.constant 0 : index
    %c0_6 = arith.constant 0 : index
    %c0_7 = arith.constant 0 : index
    %20 = vector.load %arg4[%c0_5, %c0_6, %c0_7] : memref<1x8x32xf32, #tpu.memory_space<vmem>>, vector<1x8x32xf32>
    %21 = vector.shape_cast %15 : vector<16x32xf32> to vector<2x8x32xf32>
    %cst_8 = arith.constant dense<0.000000e+00> : vector<8x32xf32>
    %22 = vector.multi_reduction <add>, %21, %cst_8 [0] : vector<2x8x32xf32> to vector<8x32xf32>
    %23 = vector.shape_cast %22 : vector<8x32xf32> to vector<1x8x32xf32>
    %24 = arith.addf %20, %23 : vector<1x8x32xf32>
    %c0_9 = arith.constant 0 : index
    %c0_10 = arith.constant 0 : index
    %c0_11 = arith.constant 0 : index
    %25 = vector.load %arg4[%c0_9, %c0_10, %c0_11] : memref<1x8x32xf32, #tpu.memory_space<vmem>>, vector<1x8x32xf32>
    tpu.vector_store %arg4[%c0_9, %c0_10, %c0_11], %24 {strides = array<i32>} : memref<1x8x32xf32, #tpu.memory_space<vmem>>, vector<1x8x32xf32>,
    %c0_12 = arith.constant 0 : index
    %c0_13 = arith.constant 0 : index
    %c0_14 = arith.constant 0 : index
    %26 = vector.load %arg5[%c0_12, %c0_13, %c0_14] : memref<1x8x32xf32, #tpu.memory_space<vmem>>, vector<1x8x32xf32>
    %27 = vector.shape_cast %19 : vector<16x32xf32> to vector<2x8x32xf32>
    %cst_15 = arith.constant dense<0.000000e+00> : vector<8x32xf32>
    %28 = vector.multi_reduction <add>, %27, %cst_15 [0] : vector<2x8x32xf32> to vector<8x32xf32>
    %29 = vector.shape_cast %28 : vector<8x32xf32> to vector<1x8x32xf32>
    %30 = arith.addf %26, %29 : vector<1x8x32xf32>
    %c0_16 = arith.constant 0 : index
    %c0_17 = arith.constant 0 : index
    %c0_18 = arith.constant 0 : index
    %31 = vector.load %arg5[%c0_16, %c0_17, %c0_18] : memref<1x8x32xf32, #tpu.memory_space<vmem>>, vector<1x8x32xf32>
    tpu.vector_store %arg5[%c0_16, %c0_17, %c0_18], %30 {strides = array<i32>} : memref<1x8x32xf32, #tpu.memory_space<vmem>>, vector<1x8x32xf32>,
    %c1_i32 = arith.constant 1 : i32
    return
  }
  func.func @transform_0(%arg0: i32, %arg1: i32) -> (i32, i32) {
    %c1_i32 = arith.constant 1 : i32
    %0 = arith.muli %arg0, %c1_i32 : i32
    %1 = arith.addi %0, %arg1 : i32
    %c0_i32 = arith.constant 0 : i32
    %c0_i32_0 = arith.constant 0 : i32
    return %1, %c0_i32 : i32, i32
  }
  func.func @transform_1(%arg0: i32, %arg1: i32) -> (i32, i32) {
    %c1_i32 = arith.constant 1 : i32
    %0 = arith.muli %arg0, %c1_i32 : i32
    %1 = arith.addi %0, %arg1 : i32
    %c0_i32 = arith.constant 0 : i32
    %c0_i32_0 = arith.constant 0 : i32
    return %1, %c0_i32 : i32, i32
  }
  func.func @transform_2(%arg0: i32, %arg1: i32) -> (i32, i32, i32) {
    %c0_i32 = arith.constant 0 : i32
    %c0_i32_0 = arith.constant 0 : i32
    %c0_i32_1 = arith.constant 0 : i32
    return %arg0, %c0_i32, %c0_i32_0 : i32, i32, i32
  }
  func.func @transform_3(%arg0: i32, %arg1: i32) -> (i32, i32, i32) {
    %c0_i32 = arith.constant 0 : i32
    %c0_i32_0 = arith.constant 0 : i32
    %c0_i32_1 = arith.constant 0 : i32
    return %arg0, %c0_i32, %c0_i32_0 : i32, i32, i32
  }
}

</mosaic_0001>

<bundles_post_ra>
// kernel: tpu_custom_call.1
= control target key start
LH: loop header
LB: loop body
LE: loop exit
PB: predicated region body
PF: predicated region fallthrough
CT: control target
= control target key end

     0   :  { %9 = vsyncpa [#allocation3], 0  ;;  %s261_s0 = inlined_call_operand.vmem [shape: f32[16,32], index: 0, kind: input, shape index: {}]   ;;  %s262_s1 = inlined_call_operand.vmem [shape: s32[16,1], index: 1, kind: input, shape index: {}]   ;;  %s263_s2 = inlined_call_operand.hbm [shape: f32[1,8,32], index: 2, kind: output, shape index: {0}]   ;;  %s264_s3 = inlined_call_operand.hbm [shape: f32[1,8,32], index: 3, kind: output, shape index: {1}]  }
   0x1   :  { %v70_v0 = vld [vmem:[%s262_s1] sm:$0xff] }
   0x2   :  { %10 = vsyncpa [#allocation5], 0  ;;  %v211_v1 = vmov 0   ;;  %vm72_vm0 = vcmp.ne.s32.totalorder %v70_v0, 0  ;;  %v71_v3 = vld [vmem:[%s262_s1 + $0x8] sm:$0xff]  ;;  %vm63_vm2 = vcmask 261120   ;;  %v66_v6 = vlaneseq }
   0x3   :  { %158 = vset.pattern.permute.xlu1 %v211_v1  ;;  %157 = vset.pattern.permute.xlu0 %v211_v1  ;;  %v74_v2 = vsel %vm72_vm0, 1, %v211_v1  ;;  %vm73_vm1 = vcmp.ne.s32.totalorder %v71_v3, 0  ;;  %v212_v5 = vmov 0.0   ;;  %v68_v10 = vld [vmem:[%s261_s0] sm:$0xff]  ;;  %v69_v13 = vld [vmem:[%s261_s0 + $0x8] sm:$0xff]  ;;  %s213_s19 = smov [#allocation2]  }
   0x4   :  { %87 = vperm.xlu1 %158, %v70_v0   ;;  %77 = vperm.xlu0 %157, %v74_v2   ;;  %v75_v4 = vsel %vm73_vm1, 1, %v211_v1  ;;  %64 = vst.msk [vmem:[#allocation2] sm:$0xff] %vm63_vm2, %v212_v5  ;;  %v67_v9 = vand.u32 127, %v66_v6  ;;  %s114_s20 = sshll.u32 %s213_s19, 4  ;;  %s116_s23 = sshll.u32 %s263_s2, 4  ;;  %s115_s20 = int_to_ptr.vmem [resolvable:$true] %s114_s20  ;;  %s117_s23 = int_to_ptr.hbm [resolvable:$true] %s116_s23 }
   0x5   :  { %65 = vst.msk [vmem:[#allocation4] sm:$0xff] %vm63_vm2, %v212_v5  ;;  %s214_s0 = smov [#allocation4]   ;;  %s127_s27 = sshll.u32 %s264_s3, 4  ;;  %s128_s27 = int_to_ptr.hbm [resolvable:$true] %s127_s27 }
   0x6   :  { %s125_s24 = sshll.u32 %s214_s0, 4  ;;  %s126_s24 = int_to_ptr.vmem [resolvable:$true] %s125_s24 }
   0xb   :  { %v96_v19 = vld [vmem:[#allocation2] sm:$0xff] }
   0xc   :  { %90 = vperm.xlu1 %158, %v71_v3   ;;  %80 = vperm.xlu0 %157, %v75_v4   ;;  %v103_v23 = vld [vmem:[#allocation4] sm:$0xff] }
  0x76   :  { %v88_v7 = vpop.permute.xlu1 %87  ;;  %v78_v8 = vpop.permute.xlu0 %77 }
  0x77   :  { %vm82_vm3 = vcmp.eq.s32.totalorder %v78_v8, 1  ;;  %vm92_vm4 = vcmp.eq.s32.totalorder %v67_v9, %v88_v7 }
  0x78   :  { %v84_v11 = vsel %vm82_vm3, %v68_v10, 0.0 }
  0x79   :  { %v94_v15 = vsel %vm92_vm4, %v84_v11, 0.0  ;;  %v98_v17 = vsel %vm63_vm2, %v84_v11, 0.0 }
  0x7a   :  { %v104_v21 = vsel %vm63_vm2, %v94_v15, 0.0 }
  0x7e   :  { %v91_v12 = vpop.permute.xlu1 %90  ;;  %v81_v14 = vpop.permute.xlu0 %80 }
  0x7f   :  { %vm83_vm5 = vcmp.eq.s32.totalorder %v81_v14, 1  ;;  %vm93_vm6 = vcmp.eq.s32.totalorder %v67_v9, %v91_v12 }
  0x80   :  { %v85_v16 = vsel %vm83_vm5, %v69_v13, 0.0 }
  0x81   :  { %v95_v18 = vsel %vm93_vm6, %v85_v16, 0.0  ;;  %v99_v20 = vsel %vm63_vm2, %v85_v16, 0.0 }
  0x82   :  { %v100_v22 = vadd.f32 %v99_v20, %v98_v17  ;;  %v105_v24 = vsel %vm63_vm2, %v95_v18, 0.0 }
  0x83   :  { %v106_v25 = vadd.f32 %v105_v24, %v104_v21 }
  0x84   :  { %v101_v26 = vadd.f32 %v100_v22, %v96_v19 }
  0x85   :  { %v107_v27 = vadd.f32 %v106_v25, %v103_v23 }
  0x86   :  { %102 = vst.msk [vmem:[#allocation2] sm:$0xff] %vm63_vm2, %v101_v26 }
  0x87   :  { %108 = vst.msk [vmem:[#allocation4] sm:$0xff] %vm63_vm2, %v107_v27  ;;  %119 = dma.vmem_to_hbm [thread:$0]  %s115_s20, 128, %s117_s23, [#allocation3]  }
  0x88   :  { %130 = dma.vmem_to_hbm [thread:$0]  %s126_s24, 128, %s128_s27, [#allocation5]  }
  0x89   :  { %207 = dma.done.wait [#allocation3], 128  }
  0x8a   :  { %208 = vsyncadd [#allocation3], 4294967168 }
  0x8b   :  { %209 = dma.done.wait [#allocation5], 128  }
  0x8c   :  { %210 = vsyncadd [#allocation5], 4294967168 }
  0x8d   :  { %139 = vsyncpa [#allocation3], 1 }
  0x8e   :  { %140 = vsyncpa [#allocation5], 1 }

</bundles_post_ra>
